<compile_context>
chip_gen: v6e
topology: v6e:2x2x1
jax: 0.10.0
libtpu: 0.0.40
codegen_flags: <defaults>
</compile_context>

<pallas_src>
import jax
import jax.numpy as jnp
from jax import lax
from jax.experimental import pallas as pl
from jax.experimental.pallas import tpu as pltpu


def _round_up(a, b):
    return (a + b - 1) // b * b


def _embedding_table_kernel(x_ref, wff_ref, bff_ref, wemb_ref, o_ref):
    # x_ref:    (tm, in_dim)        bf16
    # wff_ref:  (vocab, in_dim)     bf16   (nn.Linear weight, NOT transposed)
    # bff_ref:  (1, vocab)          f32
    # wemb_ref: (vocab, out_pad)    bf16   (out_pad = out_dim padded to 128)
    # o_ref:    (tm, out_pad)       bf16

    # Linear: contract last dims of x and W_ff (== x @ W_ff^T), f32 accumulate.
    logits = lax.dot_general(
        x_ref[...], wff_ref[...],
        dimension_numbers=(((1,), (1,)), ((), ())),
        preferred_element_type=jnp.float32,
    ) + bff_ref[...]

    # Softmax along vocab in f32 (max-subtraction for stability).
    m = jnp.max(logits, axis=-1, keepdims=True)
    e = jnp.exp(logits - m)
    denom = jnp.sum(e, axis=-1, keepdims=True)
    probs = e * pl.reciprocal(denom, approx=True)

    # Probabilistic embedding lookup: probs @ W_emb (bf16 MXU, f32 acc).
    out = jnp.dot(
        probs.astype(jnp.bfloat16), wemb_ref[...],
        preferred_element_type=jnp.float32,
    )
    o_ref[...] = out.astype(o_ref.dtype)


def _const_block_spec(shape, single_buffered):
    index_map = lambda i: (0,) * len(shape)
    if single_buffered:
        # Constant-index blocks never change across the grid; single-buffer
        # them to halve their VMEM footprint.
        return pl.BlockSpec(shape, index_map, pipeline_mode=pl.Buffered(1))
    return pl.BlockSpec(shape, index_map)


def _build_call(M_pad, in_dim, vocab, out_pad, tm, vmem_limit, single_buffered):
    return pl.pallas_call(
        _embedding_table_kernel,
        out_shape=jax.ShapeDtypeStruct((M_pad, out_pad), jnp.bfloat16),
        grid_spec=pltpu.PrefetchScalarGridSpec(
            num_scalar_prefetch=0,
            grid=(M_pad // tm,),
            in_specs=[
                pl.BlockSpec((tm, in_dim), lambda i: (i, 0)),
                _const_block_spec((vocab, in_dim), single_buffered),
                _const_block_spec((1, vocab), single_buffered),
                _const_block_spec((vocab, out_pad), single_buffered),
            ],
            out_specs=pl.BlockSpec((tm, out_pad), lambda i: (i, 0)),
        ),
        compiler_params=pltpu.CompilerParams(
            dimension_semantics=("parallel",),
            vmem_limit_bytes=vmem_limit,
        ),
    )


def prepare_embedding_table_params(w_ff, b_ff, w_emb):
    """One-time weight prep (dtype casts + lane-dense padding). Do NOT call
    per forward pass."""
    vocab, in_dim = w_ff.shape
    vocab2, out_dim = w_emb.shape
    assert vocab2 == vocab and b_ff.shape == (vocab,)

    out_pad = _round_up(max(out_dim, 128), 128)      # lane-dense output width
    wff = w_ff.astype(jnp.bfloat16)                  # (vocab, in_dim)
    bff = b_ff.reshape(1, vocab).astype(jnp.float32)  # bias added in f32
    wemb = w_emb.astype(jnp.bfloat16)                # (vocab, out_dim)
    if out_pad != out_dim:
        wemb = jnp.pad(wemb, ((0, 0), (0, out_pad - out_dim)))
    return wff, bff, wemb, out_dim


def embedding_table_forward(x, params, *, tm=None):
    """x: (B, S, in_dim) float32.  params from prepare_embedding_table_params.
    Returns (B, S, out_dim) bfloat16."""
    wff, bff, wemb_padded, out_dim = params
    B, S, in_dim = x.shape
    vocab = wff.shape[0]
    out_pad = wemb_padded.shape[1]
    M = B * S

    if tm is None:
        # >=16 rows (bf16 sublane packing), MXU-aligned up to 256, one grid
        # step for small M.
        tm = min(256, _round_up(M, 16))
    M_pad = _round_up(M, tm)

    x2 = x.reshape(M, in_dim).astype(jnp.bfloat16)
    if M_pad != M:
        x2 = jnp.pad(x2, ((0, M_pad - M), (0, 0)))

    # VMEM estimate: resident weights + double-buffered x/out tiles + f32
    # logits/probs intermediates.  Cap at 64 MiB (v7x per-TC capacity).
    est = (vocab * in_dim * 2 + vocab * out_pad * 2 + vocab * 4
           + 2 * tm * in_dim * 2 + 2 * tm * out_pad * 2
           + 2 * tm * vocab * 4)
    vmem_limit = int(min(max(2 * est, 32 * 1024 * 1024), 64 * 1024 * 1024))

    out = None
    last_err = None
    for single_buffered in (True, False):
        try:
            call = _build_call(M_pad, in_dim, vocab, out_pad, tm,
                               vmem_limit, single_buffered)
            out = jax.block_until_ready(call(x2, wff, bff, wemb_padded))
            break
        except Exception as e:  # pipeline_mode unsupported -> default buffering
            last_err = e
            if not single_buffered:
                raise
    assert out is not None, last_err

    return out[:M, :out_dim].reshape(B, S, out_dim)


def reference_forward(x, w_ff, b_ff, w_emb):
    """Pure-JAX reference with the same autocast-style dtype handling."""
    xb = x.astype(jnp.bfloat16)
    logits = jnp.dot(xb, w_ff.T.astype(jnp.bfloat16),
                     preferred_element_type=jnp.float32) + b_ff.astype(jnp.float32)
    probs = jax.nn.softmax(logits, axis=-1)
    out = jnp.dot(probs.astype(jnp.bfloat16), w_emb.astype(jnp.bfloat16),
                  preferred_element_type=jnp.float32)
    return out.astype(jnp.bfloat16)


if __name__ == "__main__":
    # Small deterministic config consistent with the module:
    #   in_dim=32, vocab_size=256, out_dim=64, batch=2, seq=8.
    B, S, in_dim, vocab, out_dim = 2, 8, 32, 256, 64

    key = jax.random.PRNGKey(0)
    kx, kw1, kb1, kemb = jax.random.split(key, 4)

    x = jax.random.normal(kx, (B, S, in_dim), dtype=jnp.float32)

    # nn.Linear(in_dim, vocab): weight (vocab, in_dim), bias (vocab,)
    bound = 1.0 / jnp.sqrt(in_dim)
    w_ff = jax.random.uniform(kw1, (vocab, in_dim), minval=-bound, maxval=bound,
                              dtype=jnp.float32)
    b_ff = jax.random.uniform(kb1, (vocab,), minval=-bound, maxval=bound,
                              dtype=jnp.float32)

    # ProbalisticTokenEmbedding.reset_parameters: normal(0, 1), no padding_idx.
    w_emb = jax.random.normal(kemb, (vocab, out_dim), dtype=jnp.float32)

    params = prepare_embedding_table_params(w_ff, b_ff, w_emb)  # once, at init
    out = embedding_table_forward(x, params)
    out = jax.block_until_ready(out)

    ref = jax.block_until_ready(reference_forward(x, w_ff, b_ff, w_emb))

    assert out.shape == (B, S, out_dim)
    assert out.dtype == jnp.bfloat16
    err = jnp.max(jnp.abs(out.astype(jnp.float32) - ref.astype(jnp.float32)))
    assert float(err) < 1e-1, f"max abs error too large: {err}"

    print("KERNEL_OK")
</pallas_src>

<mosaic_0001>
module attributes {stable_mosaic.version = 11 : i64} {
  func.func @_embedding_table_kernel(%arg0: i32, %arg1: memref<16x32xbf16, #tpu.memory_space<vmem>>, %arg2: memref<256x32xbf16, #tpu.memory_space<vmem>>, %arg3: memref<1x256xf32, #tpu.memory_space<vmem>>, %arg4: memref<256x128xbf16, #tpu.memory_space<vmem>>, %arg5: memref<16x128xbf16, #tpu.memory_space<vmem>>) attributes {dimension_semantics = [#tpu.dimension_semantics<parallel>], iteration_bounds = array<i64: 1>, scalar_prefetch = 0 : i64, scratch_operands = 0 : i64, tpu.core_type = #tpu.core_type<tc>, window_params = [{transform_indices = @transform_0, window_bounds = array<i64: 16, 32>}, {pipeline_mode = #tpu.pipeline_mode<synchronous>, transform_indices = @transform_1, window_bounds = array<i64: 256, 32>}, {pipeline_mode = #tpu.pipeline_mode<synchronous>, transform_indices = @transform_2, window_bounds = array<i64: 1, 256>}, {pipeline_mode = #tpu.pipeline_mode<synchronous>, transform_indices = @transform_3, window_bounds = array<i64: 256, 128>}, {transform_indices = @transform_4, window_bounds = array<i64: 16, 128>}]} {
    %c0 = arith.constant 0 : index
    %c0_0 = arith.constant 0 : index
    %0 = vector.load %arg1[%c0, %c0_0] : memref<16x32xbf16, #tpu.memory_space<vmem>>, vector<16x32xbf16>
    %c0_1 = arith.constant 0 : index
    %c0_2 = arith.constant 0 : index
    %1 = vector.load %arg2[%c0_1, %c0_2] : memref<256x32xbf16, #tpu.memory_space<vmem>>, vector<256x32xbf16>
    %cst = arith.constant dense<0.000000e+00> : vector<16x256xf32>
    %2 = tpu.matmul %0, %1, %cst {dimension_numbers = #tpu.dot_dimension_numbers<[1], [1], [0], [0], [0, 0, 1, 0], [], []>} : vector<16x32xbf16>, vector<256x32xbf16>, vector<16x256xf32> -> vector<16x256xf32>
    %c0_3 = arith.constant 0 : index
    %c0_4 = arith.constant 0 : index
    %3 = vector.load %arg3[%c0_3, %c0_4] : memref<1x256xf32, #tpu.memory_space<vmem>>, vector<1x256xf32>
    %4 = vector.broadcast %3 : vector<1x256xf32> to vector<16x256xf32>
    %5 = arith.addf %2, %4 : vector<16x256xf32>
    %cst_5 = arith.constant dense<0xFF800000> : vector<16xf32>
    %6 = vector.multi_reduction <maximumf>, %5, %cst_5 [1] : vector<16x256xf32> to vector<16xf32>
    %7 = vector.shape_cast %6 : vector<16xf32> to vector<16x1xf32>
    %8 = vector.broadcast %7 : vector<16x1xf32> to vector<16x256xf32>
    %9 = arith.subf %5, %8 : vector<16x256xf32>
    %10 = math.exp %9 : vector<16x256xf32>
    %cst_6 = arith.constant dense<0.000000e+00> : vector<16xf32>
    %11 = vector.multi_reduction <add>, %10, %cst_6 [1] : vector<16x256xf32> to vector<16xf32>
    %12 = vector.shape_cast %11 : vector<16xf32> to vector<16x1xf32>
    %13 = tpu.reciprocal %12 {approx = true} : vector<16x1xf32> -> vector<16x1xf32>
    %14 = vector.broadcast %13 : vector<16x1xf32> to vector<16x256xf32>
    %15 = arith.mulf %10, %14 : vector<16x256xf32>
    %16 = arith.truncf %15 : vector<16x256xf32> to vector<16x256xbf16>
    %c0_7 = arith.constant 0 : index
    %c0_8 = arith.constant 0 : index
    %17 = vector.load %arg4[%c0_7, %c0_8] : memref<256x128xbf16, #tpu.memory_space<vmem>>, vector<256x128xbf16>
    %cst_9 = arith.constant dense<0.000000e+00> : vector<16x128xf32>
    %18 = tpu.matmul %16, %17, %cst_9 {dimension_numbers = #tpu.dot_dimension_numbers<[1], [0], [0], [1], [0, 0, 1, 1], [], []>} : vector<16x256xbf16>, vector<256x128xbf16>, vector<16x128xf32> -> vector<16x128xf32>
    %19 = arith.truncf %18 : vector<16x128xf32> to vector<16x128xbf16>
    %c0_10 = arith.constant 0 : index
    %c0_11 = arith.constant 0 : index
    %20 = vector.load %arg5[%c0_10, %c0_11] : memref<16x128xbf16, #tpu.memory_space<vmem>>, vector<16x128xbf16>
    tpu.vector_store %arg5[%c0_10, %c0_11], %19 {strides = array<i32>} : memref<16x128xbf16, #tpu.memory_space<vmem>>, vector<16x128xbf16>,
    return
  }
  func.func @transform_0(%arg0: i32) -> (i32, i32) {
    %c0_i32 = arith.constant 0 : i32
    %c0_i32_0 = arith.constant 0 : i32
    return %arg0, %c0_i32 : i32, i32
  }
  func.func @transform_1(%arg0: i32) -> (i32, i32) {
    %c0_i32 = arith.constant 0 : i32
    %c0_i32_0 = arith.constant 0 : i32
    %c0_i32_1 = arith.constant 0 : i32
    return %c0_i32, %c0_i32_0 : i32, i32
  }
  func.func @transform_2(%arg0: i32) -> (i32, i32) {
    %c0_i32 = arith.constant 0 : i32
    %c0_i32_0 = arith.constant 0 : i32
    %c0_i32_1 = arith.constant 0 : i32
    return %c0_i32, %c0_i32_0 : i32, i32
  }
  func.func @transform_3(%arg0: i32) -> (i32, i32) {
    %c0_i32 = arith.constant 0 : i32
    %c0_i32_0 = arith.constant 0 : i32
    %c0_i32_1 = arith.constant 0 : i32
    return %c0_i32, %c0_i32_0 : i32, i32
  }
  func.func @transform_4(%arg0: i32) -> (i32, i32) {
    %c0_i32 = arith.constant 0 : i32
    %c0_i32_0 = arith.constant 0 : i32
    return %arg0, %c0_i32 : i32, i32
  }
}

module attributes {stable_mosaic.version = 11 : i64} {
  func.func @_embedding_table_kernel(%arg0: i32, %arg1: memref<16x32xbf16, #tpu.memory_space<vmem>>, %arg2: memref<256x32xbf16, #tpu.memory_space<vmem>>, %arg3: memref<1x256xf32, #tpu.memory_space<vmem>>, %arg4: memref<256x128xbf16, #tpu.memory_space<vmem>>, %arg5: memref<16x128xbf16, #tpu.memory_space<vmem>>) attributes {dimension_semantics = [#tpu.dimension_semantics<parallel>], iteration_bounds = array<i64: 1>, scalar_prefetch = 0 : i64, scratch_operands = 0 : i64, tpu.core_type = #tpu.core_type<tc>, window_params = [{transform_indices = @transform_0, window_bounds = array<i64: 16, 32>}, {pipeline_mode = #tpu.pipeline_mode<synchronous>, transform_indices = @transform_1, window_bounds = array<i64: 256, 32>}, {pipeline_mode = #tpu.pipeline_mode<synchronous>, transform_indices = @transform_2, window_bounds = array<i64: 1, 256>}, {pipeline_mode = #tpu.pipeline_mode<synchronous>, transform_indices = @transform_3, window_bounds = array<i64: 256, 128>}, {transform_indices = @transform_4, window_bounds = array<i64: 16, 128>}]} {
    %c0 = arith.constant 0 : index
    %c0_0 = arith.constant 0 : index
    %0 = vector.load %arg1[%c0, %c0_0] : memref<16x32xbf16, #tpu.memory_space<vmem>>, vector<16x32xbf16>
    %c0_1 = arith.constant 0 : index
    %c0_2 = arith.constant 0 : index
    %1 = vector.load %arg2[%c0_1, %c0_2] : memref<256x32xbf16, #tpu.memory_space<vmem>>, vector<256x32xbf16>
    %cst = arith.constant dense<0.000000e+00> : vector<16x256xf32>
    %2 = tpu.matmul %0, %1, %cst {dimension_numbers = #tpu.dot_dimension_numbers<[1], [1], [0], [0], [0, 0, 1, 0], [], []>} : vector<16x32xbf16>, vector<256x32xbf16>, vector<16x256xf32> -> vector<16x256xf32>
    %c0_3 = arith.constant 0 : index
    %c0_4 = arith.constant 0 : index
    %3 = vector.load %arg3[%c0_3, %c0_4] : memref<1x256xf32, #tpu.memory_space<vmem>>, vector<1x256xf32>
    %4 = vector.broadcast %3 : vector<1x256xf32> to vector<16x256xf32>
    %5 = arith.addf %2, %4 : vector<16x256xf32>
    %cst_5 = arith.constant dense<0xFF800000> : vector<16xf32>
    %6 = vector.multi_reduction <maximumf>, %5, %cst_5 [1] : vector<16x256xf32> to vector<16xf32>
    %7 = vector.shape_cast %6 : vector<16xf32> to vector<16x1xf32>
    %8 = vector.broadcast %7 : vector<16x1xf32> to vector<16x256xf32>
    %9 = arith.subf %5, %8 : vector<16x256xf32>
    %10 = math.exp %9 : vector<16x256xf32>
    %cst_6 = arith.constant dense<0.000000e+00> : vector<16xf32>
    %11 = vector.multi_reduction <add>, %10, %cst_6 [1] : vector<16x256xf32> to vector<16xf32>
    %12 = vector.shape_cast %11 : vector<16xf32> to vector<16x1xf32>
    %13 = tpu.reciprocal %12 {approx = true} : vector<16x1xf32> -> vector<16x1xf32>
    %14 = vector.broadcast %13 : vector<16x1xf32> to vector<16x256xf32>
    %15 = arith.mulf %10, %14 : vector<16x256xf32>
    %16 = arith.truncf %15 : vector<16x256xf32> to vector<16x256xbf16>
    %c0_7 = arith.constant 0 : index
    %c0_8 = arith.constant 0 : index
    %17 = vector.load %arg4[%c0_7, %c0_8] : memref<256x128xbf16, #tpu.memory_space<vmem>>, vector<256x128xbf16>
    %cst_9 = arith.constant dense<0.000000e+00> : vector<16x128xf32>
    %18 = tpu.matmul %16, %17, %cst_9 {dimension_numbers = #tpu.dot_dimension_numbers<[1], [0], [0], [1], [0, 0, 1, 1], [], []>} : vector<16x256xbf16>, vector<256x128xbf16>, vector<16x128xf32> -> vector<16x128xf32>
    %19 = arith.truncf %18 : vector<16x128xf32> to vector<16x128xbf16>
    %c0_10 = arith.constant 0 : index
    %c0_11 = arith.constant 0 : index
    %20 = vector.load %arg5[%c0_10, %c0_11] : memref<16x128xbf16, #tpu.memory_space<vmem>>, vector<16x128xbf16>
    tpu.vector_store %arg5[%c0_10, %c0_11], %19 {strides = array<i32>} : memref<16x128xbf16, #tpu.memory_space<vmem>>, vector<16x128xbf16>,
    return
  }
  func.func @transform_0(%arg0: i32) -> (i32, i32) {
    %c0_i32 = arith.constant 0 : i32
    %c0_i32_0 = arith.constant 0 : i32
    return %arg0, %c0_i32 : i32, i32
  }
  func.func @transform_1(%arg0: i32) -> (i32, i32) {
    %c0_i32 = arith.constant 0 : i32
    %c0_i32_0 = arith.constant 0 : i32
    %c0_i32_1 = arith.constant 0 : i32
    return %c0_i32, %c0_i32_0 : i32, i32
  }
  func.func @transform_2(%arg0: i32) -> (i32, i32) {
    %c0_i32 = arith.constant 0 : i32
    %c0_i32_0 = arith.constant 0 : i32
    %c0_i32_1 = arith.constant 0 : i32
    return %c0_i32, %c0_i32_0 : i32, i32
  }
  func.func @transform_3(%arg0: i32) -> (i32, i32) {
    %c0_i32 = arith.constant 0 : i32
    %c0_i32_0 = arith.constant 0 : i32
    %c0_i32_1 = arith.constant 0 : i32
    return %c0_i32, %c0_i32_0 : i32, i32
  }
  func.func @transform_4(%arg0: i32) -> (i32, i32) {
    %c0_i32 = arith.constant 0 : i32
    %c0_i32_0 = arith.constant 0 : i32
    return %arg0, %c0_i32 : i32, i32
  }
}

</mosaic_0001>

<bundles_post_ra>
// kernel: tpu_custom_call.1
= control target key start
LH: loop header
LB: loop body
LE: loop exit
PB: predicated region body
PF: predicated region fallthrough
CT: control target
= control target key end

     0   :  { %vm150_vm0 = vcmask 261120   ;;  %s784_s0 = inlined_call_operand.vmem [shape: bf16[16,32], index: 0, kind: input, shape index: {}]   ;;  %s785_s1 = inlined_call_operand.vmem [shape: bf16[256,32], index: 1, kind: input, shape index: {}]   ;;  %s786_s2 = inlined_call_operand.vmem [shape: f32[1,256], index: 2, kind: input, shape index: {}]   ;;  %s787_s3 = inlined_call_operand.vmem [shape: bf16[256,128], index: 3, kind: input, shape index: {}]   ;;  %s788_s4 = inlined_call_operand.hbm [shape: bf16[16,128], index: 4, kind: output, shape index: {}]  }
   0x1   :  { %v566_v0 = vld [vmem:[%s785_s1 + $0x78] sm:$0xff]   ;;  %v568_v2 = vld [vmem:[%s785_s1 + $0x70] sm:$0xff]   ;;  %v570_v6 = vld [vmem:[%s785_s1 + $0x68] sm:$0xff]  }
   0x2   :  { %v567_v1 = vld [vmem:[%s785_s1 + $0x38] sm:$0xff]   ;;  %555 = vmatprep.subr.msk.bf16.mxu0 %vm150_vm0, %v566_v0  ;;  %v569_v4 = vld [vmem:[%s785_s1 + $0x30] sm:$0xff]   ;;  %v571_v7 = vld [vmem:[%s785_s1 + $0x28] sm:$0xff]  }
   0x3   :  { %v176_v3 = vsel %vm150_vm0, %v567_v1, 0  ;;  %v173_v5 = vsel %vm150_vm0, %v569_v4, 0  ;;  %v573_v8 = vld [vmem:[%s785_s1 + $0x20] sm:$0xff]   ;;  %v170_v10 = vsel %vm150_vm0, %v571_v7, 0  ;;  %v574_v13 = vld [vmem:[%s785_s1 + $0x58] sm:$0xff]  }
   0x4   :  { %516 = vmatpush3.bf16.xpose.msra.mxu0 %v176_v3  ;;  %v582_v9 = vld [vmem:[%s784_s0] sm:$0xff]   ;;  %v167_v12 = vsel %vm150_vm0, %v573_v8, 0 }
   0x5   :  { %556 = vmatprep.subr.msk.bf16.mxu0 %vm150_vm0, %v568_v2  ;;  %v572_v11 = vld [vmem:[%s785_s1 + $0x60] sm:$0xff]   ;;  %531 = vmatprep.mubr.msk.bf16.mxu0 %vm150_vm0, %v582_v9 }
   0xc   :  { %518 = vmatpush3.bf16.xpose.msra.mxu0 %v173_v5 }
   0xd   :  { %557 = vmatprep.subr.msk.bf16.mxu0 %vm150_vm0, %v570_v6 }
  0x14   :  { %520 = vmatpush3.bf16.xpose.msra.mxu0 %v170_v10 }
  0x15   :  { %558 = vmatprep.subr.msk.bf16.mxu0 %vm150_vm0, %v572_v11 }
  0x1c   :  { %522 = vmatpush3.bf16.xpose.msra.mxu0 %v167_v12 }
  0x1d   :  { %9 = vsyncpa [#allocation3], 0  ;;  %559 = vmatprep.subr.msk.bf16.mxu0 %vm150_vm0, %v574_v13  ;;  %v575_v14 = vld [vmem:[%s785_s1 + $0x18] sm:$0xff]   ;;  %v576_v16 = vld [vmem:[%s785_s1 + $0x50] sm:$0xff]   ;;  %v55_v25 = vlaneseq }
  0x1e   :  { %v164_v15 = vsel %vm150_vm0, %v575_v14, 0  ;;  %v577_v17 = vld [vmem:[%s785_s1 + $0x10] sm:$0xff]   ;;  %v578_v19 = vld [vmem:[%s785_s1 + $0x48] sm:$0xff]   ;;  %v580_v22 = vld [vmem:[%s785_s1 + $0x40] sm:$0xff]  }
  0x1f   :  { %v161_v18 = vsel %vm150_vm0, %v577_v17, 0  ;;  %v579_v20 = vld [vmem:[%s785_s1 + $0x8] sm:$0xff]   ;;  %v581_v23 = vld [vmem:[%s785_s1] sm:$0xff]   ;;  %v56_v26 = vshrl.u32 %v55_v25, 7  ;;  %v583_v42 = vld [vmem:[%s787_s3 + $0x78] sm:$0xff]  }
  0x20   :  { %v158_v21 = vsel %vm150_vm0, %v579_v20, 0  ;;  %v155_v24 = vsel %vm150_vm0, %v581_v23, 0  ;;  %v53_v29 = vld [vmem:[%s786_s2] sm:$0x3]  ;;  %v584_v43 = vld [vmem:[%s787_s3 + $0x38] sm:$0xff]   ;;  %v585_v44 = vld [vmem:[%s787_s3 + $0x70] sm:$0xff]   ;;  %533 = vmatprep.subr.bf16.mxu1 %v583_v42 }
  0x21   :  { %v57_v27 = vsub.s32 0, %v56_v26  ;;  %v61_v28 = vsub.s32 1, %v56_v26  ;;  %534 = vmatpush3.bf16.msra.mxu1 %v584_v43  ;;  %v586_v45 = vld [vmem:[%s787_s3 + $0x30] sm:$0xff]   ;;  %v587_v46 = vld [vmem:[%s787_s3 + $0x68] sm:$0xff]   ;;  %v589_v0 = vld [vmem:[%s787_s3 + $0x60] sm:$0xff]  }
  0x22   :  { %535 = vmatprep.subr.bf16.mxu1 %v585_v44  ;;  %v588_v63 = vld [vmem:[%s787_s3 + $0x28] sm:$0xff]   ;;  %v590_v1 = vld [vmem:[%s787_s3 + $0x20] sm:$0xff]   ;;  %v591_v2 = vld [vmem:[%s787_s3 + $0x58] sm:$0xff]  }
  0x23   :  { %v58_v30 = vrot.slane %v53_v29, %v57_v27  ;;  %v62_v31 = vrot.slane %v53_v29, %v61_v28  ;;  %v592_v3 = vld [vmem:[%s787_s3 + $0x18] sm:$0xff]   ;;  %v593_v4 = vld [vmem:[%s787_s3 + $0x50] sm:$0xff]   ;;  %v595_v6 = vld [vmem:[%s787_s3 + $0x48] sm:$0xff]  }
  0x24   :  { %524 = vmatpush3.bf16.xpose.msra.mxu0 %v164_v15  ;;  %v594_v5 = vld [vmem:[%s787_s3 + $0x10] sm:$0xff]   ;;  %v596_v7 = vld [vmem:[%s787_s3 + $0x8] sm:$0xff]   ;;  %v597_v8 = vld [vmem:[%s787_s3 + $0x40] sm:$0xff]  }
  0x25   :  { %560 = vmatprep.subr.msk.bf16.mxu0 %vm150_vm0, %v576_v16  ;;  %536 = vmatpush3.bf16.msra.mxu1 %v586_v45 }
  0x26   :  { %537 = vmatprep.subr.bf16.mxu1 %v587_v46 }
  0x29   :  { %538 = vmatpush3.bf16.msra.mxu1 %v588_v63 }
  0x2a   :  { %539 = vmatprep.subr.bf16.mxu1 %v589_v0 }
  0x2c   :  { %526 = vmatpush3.bf16.xpose.msra.mxu0 %v161_v18 }
  0x2d   :  { %561 = vmatprep.subr.msk.bf16.mxu0 %vm150_vm0, %v578_v19  ;;  %540 = vmatpush3.bf16.msra.mxu1 %v590_v1 }
  0x2e   :  { %541 = vmatprep.subr.bf16.mxu1 %v591_v2 }
  0x31   :  { %542 = vmatpush3.bf16.msra.mxu1 %v592_v3 }
  0x32   :  { %543 = vmatprep.subr.bf16.mxu1 %v593_v4 }
  0x34   :  { %528 = vmatpush3.bf16.xpose.msra.mxu0 %v158_v21 }
  0x35   :  { %562 = vmatprep.subr.msk.bf16.mxu0 %vm150_vm0, %v580_v22  ;;  %544 = vmatpush3.bf16.msra.mxu1 %v594_v5 }
  0x36   :  { %545 = vmatprep.subr.bf16.mxu1 %v595_v6 }
  0x39   :  { %546 = vmatpush3.bf16.msra.mxu1 %v596_v7 }
  0x3a   :  { %547 = vmatprep.subr.bf16.mxu1 %v597_v8 }
  0x3c   :  { %530 = vmatpush3.bf16.xpose.msra.mxu0 %v155_v24 }
  0x43   :  { %532 = vmatmul.mubr.msk.bf16.vlgmr.msra.gmra.mxu0 %vm150_vm0, %v582_v9  ;;  %v598_v9 = vld [vmem:[%s787_s3] sm:$0xff]   ;;  %s633_s3 = smov [#allocation2]  }
  0x44   :  { %548 = vmatpush3.bf16.msra.mxu1 %v598_v9  ;;  %s461_s2 = sshll.u32 %s633_s3, 4  ;;  %s462_s2 = int_to_ptr.vmem [resolvable:$true] %s461_s2 }
  0x45   :  { %s611_s26 = scalar_lea.vmem %s462_s2, 128  ;;  %p616_p1 = scmp.lt.s32.totalorder %s462_s2, %s462_s2 }
  0x46   :  { %p612_p0 = scmp.ne.s32.totalorder %s462_s2, %s611_s26  ;;  %p617_p2 = scmp.lt.s32.totalorder %s611_s26, %s611_s26 }
  0x48   :  { %p618_p3 = por %p617_p2, %p616_p1 }
  0x4a   :  { %p619_p4 = pnand %p618_p3, %p612_p0 }
 0x103   :  { %v236_v32 = vpop.f32.mrf.mxu0 }
 0x104   :  { %v237_v34 = vadd.f32 %v236_v32, %v58_v30 }
 0x105   :  { %v238_v33 = vpop.f32.mrf.mxu0 }
 0x106   :  { %v239_v35 = vadd.f32 %v238_v33, %v62_v31 }
 0x107   :  { %v240_v36 = vpop.f32.mrf.mxu0 }
 0x108   :  { %v245_v37 = vmax.f32 %v237_v34, %v239_v35  ;;  %v241_v39 = vadd.f32 %v240_v36, %v58_v30 }
 0x109   :  { %v242_v38 = vpop.f32.mrf.mxu0 }
 0x10a   :  { %v243_v40 = vadd.f32 %v242_v38, %v62_v31  ;;  %246 = vmax.xlane.f32.xlu0 %v245_v37 }
 0x10c   :  { %v248_v41 = vmax.f32 %v241_v39, %v243_v40 }
 0x10e   :  { %249 = vmax.xlane.f32.xlu0 %v248_v41 }
 0x193   :  { %v247_v47 = vpop.xlane.xlu0 %246 }
 0x194   :  { %v251_v48 = vsub.f32 %v237_v34, %v247_v47  ;;  %v252_v49 = vsub.f32 %v239_v35, %v247_v47 }
 0x196   :  { %v255_v50 = vmul.f32 1.442695, %v251_v48  ;;  %v257_v51 = vmul.f32 1.442695, %v252_v49 }
 0x197   :  { %v250_v52 = vpop.xlane.xlu0 %249 }
 0x198   :  { %599 = vpow2.f32 %v255_v50  ;;  %v253_v53 = vsub.f32 %v241_v39, %v250_v52  ;;  %v254_v54 = vsub.f32 %v243_v40, %v250_v52 }
 0x199   :  { %601 = vpow2.f32 %v257_v51 }
 0x19a   :  { %v259_v55 = vmul.f32 1.442695, %v253_v53  ;;  %v261_v56 = vmul.f32 1.442695, %v254_v54 }
 0x19c   :  { %603 = vpow2.f32 %v259_v55 }
 0x19d   :  { %605 = vpow2.f32 %v261_v56 }
 0x1a5   :  { %v600_v57 = vpop.eup %599 }
 0x1a6   :  { %v602_v58 = vpop.eup %601 }
 0x1a7   :  { %v263_v59 = vadd.f32 %v602_v58, %v600_v57 }
 0x1a9   :  { %v604_v60 = vpop.eup %603  ;;  %264 = vadd.xlane.f32.xlu1 %v263_v59 }
 0x1aa   :  { %v606_v61 = vpop.eup %605 }
 0x1ab   :  { %v266_v62 = vadd.f32 %v606_v61, %v604_v60 }
 0x1ad   :  { %267 = vadd.xlane.f32.xlu1 %v266_v62 }
 0x232   :  { %v265_v10 = vpop.xlane.xlu1 %264 }
 0x233   :  { %607 = vrcp.f32 %v265_v10 }
 0x236   :  { %v268_v11 = vpop.xlane.xlu1 %267 }
 0x237   :  { %609 = vrcp.f32 %v268_v11 }
 0x240   :  { %v608_v12 = vpop.eup %607 }
 0x241   :  { %v272_v14 = vmul.f32 %v608_v12, %v602_v58  ;;  %v271_v16 = vmul.f32 %v608_v12, %v600_v57 }
 0x244   :  { %v610_v13 = vpop.eup %609 }
 0x245   :  { %v274_v15 = vmul.f32 %v610_v13, %v606_v61  ;;  %v273_v17 = vmul.f32 %v610_v13, %v604_v60 }
 0x247   :  { %v276_v18 = vpack.c.bf16 %v274_v15, %v272_v14  ;;  %v275_v19 = vpack.c.bf16 %v273_v17, %v271_v16 }
 0x249   :  { %437 = vmatprep.mubr.bf16.mxu1 %v276_v18 }
 0x24a   :  { %438 = vmatmul.mubr.bf16.vlgmr.msra.gmra.mxu1 %v275_v19 }
 0x30a   :  { %v549_v20 = vpop.f32.mrf.mxu1 }
 0x30c   :  { %v550_v21 = vpop.f32.mrf.mxu1 }
 0x30d   :  { %v551_v24 = vadd.f32 %v550_v21, %v549_v20 }
 0x30e   :  { %v552_v22 = vpop.f32.mrf.mxu1 }
 0x310   :  { %v553_v23 = vpop.f32.mrf.mxu1 }
 0x311   :  { %v554_v25 = vadd.f32 %v553_v23, %v552_v22 }
 0x313   :  { %v513_v26 = vpack.c.bf16 %v554_v25, %v551_v24 }
 0x315   :  { %514 = vst [vmem:[#allocation2] sm:$0xff] %v513_v26  }
 0x316   :  { %622 = shalt.err (!%p619_p4)
}
 0x317   :  { %s634_s27 = smov 64   ;;  %s635_s28 = smov 4  }
 0x318   :  { %467 = dma.vmem_to_hbm [thread:$0]  %s462_s2, 128, %s788_s4, [#allocation3], %s634_s27, %s634_s27, %s635_s28  }
 0x319   :  { %631 = dma.done.wait [#allocation3], 128  }
 0x31a   :  { %632 = vsyncadd [#allocation3], 4294967168 }
 0x31b   :  { %471 = vsyncpa [#allocation3], 1 }

// kernel: tpu_custom_call.1
= control target key start
LH: loop header
LB: loop body
LE: loop exit
PB: predicated region body
PF: predicated region fallthrough
CT: control target
= control target key end

     0   :  { %vm150_vm0 = vcmask 261120   ;;  %s784_s0 = inlined_call_operand.vmem [shape: bf16[16,32], index: 0, kind: input, shape index: {}]   ;;  %s785_s1 = inlined_call_operand.vmem [shape: bf16[256,32], index: 1, kind: input, shape index: {}]   ;;  %s786_s2 = inlined_call_operand.vmem [shape: f32[1,256], index: 2, kind: input, shape index: {}]   ;;  %s787_s3 = inlined_call_operand.vmem [shape: bf16[256,128], index: 3, kind: input, shape index: {}]   ;;  %s788_s4 = inlined_call_operand.hbm [shape: bf16[16,128], index: 4, kind: output, shape index: {}]  }
   0x1   :  { %v566_v0 = vld [vmem:[%s785_s1 + $0x78] sm:$0xff]   ;;  %v568_v2 = vld [vmem:[%s785_s1 + $0x70] sm:$0xff]   ;;  %v570_v6 = vld [vmem:[%s785_s1 + $0x68] sm:$0xff]  }
   0x2   :  { %v567_v1 = vld [vmem:[%s785_s1 + $0x38] sm:$0xff]   ;;  %555 = vmatprep.subr.msk.bf16.mxu0 %vm150_vm0, %v566_v0  ;;  %v569_v4 = vld [vmem:[%s785_s1 + $0x30] sm:$0xff]   ;;  %v571_v7 = vld [vmem:[%s785_s1 + $0x28] sm:$0xff]  }
   0x3   :  { %v176_v3 = vsel %vm150_vm0, %v567_v1, 0  ;;  %v173_v5 = vsel %vm150_vm0, %v569_v4, 0  ;;  %v573_v8 = vld [vmem:[%s785_s1 + $0x20] sm:$0xff]   ;;  %v170_v10 = vsel %vm150_vm0, %v571_v7, 0  ;;  %v574_v13 = vld [vmem:[%s785_s1 + $0x58] sm:$0xff]  }
   0x4   :  { %516 = vmatpush3.bf16.xpose.msra.mxu0 %v176_v3  ;;  %v582_v9 = vld [vmem:[%s784_s0] sm:$0xff]   ;;  %v167_v12 = vsel %vm150_vm0, %v573_v8, 0 }
   0x5   :  { %556 = vmatprep.subr.msk.bf16.mxu0 %vm150_vm0, %v568_v2  ;;  %v572_v11 = vld [vmem:[%s785_s1 + $0x60] sm:$0xff]   ;;  %531 = vmatprep.mubr.msk.bf16.mxu0 %vm150_vm0, %v582_v9 }
   0xc   :  { %518 = vmatpush3.bf16.xpose.msra.mxu0 %v173_v5 }
   0xd   :  { %557 = vmatprep.subr.msk.bf16.mxu0 %vm150_vm0, %v570_v6 }
  0x14   :  { %520 = vmatpush3.bf16.xpose.msra.mxu0 %v170_v10 }
  0x15   :  { %558 = vmatprep.subr.msk.bf16.mxu0 %vm150_vm0, %v572_v11 }
  0x1c   :  { %522 = vmatpush3.bf16.xpose.msra.mxu0 %v167_v12 }
  0x1d   :  { %9 = vsyncpa [#allocation3], 0  ;;  %559 = vmatprep.subr.msk.bf16.mxu0 %vm150_vm0, %v574_v13  ;;  %v575_v14 = vld [vmem:[%s785_s1 + $0x18] sm:$0xff]   ;;  %v576_v16 = vld [vmem:[%s785_s1 + $0x50] sm:$0xff]   ;;  %v55_v25 = vlaneseq }
  0x1e   :  { %v164_v15 = vsel %vm150_vm0, %v575_v14, 0  ;;  %v577_v17 = vld [vmem:[%s785_s1 + $0x10] sm:$0xff]   ;;  %v578_v19 = vld [vmem:[%s785_s1 + $0x48] sm:$0xff]   ;;  %v580_v22 = vld [vmem:[%s785_s1 + $0x40] sm:$0xff]  }
  0x1f   :  { %v161_v18 = vsel %vm150_vm0, %v577_v17, 0  ;;  %v579_v20 = vld [vmem:[%s785_s1 + $0x8] sm:$0xff]   ;;  %v581_v23 = vld [vmem:[%s785_s1] sm:$0xff]   ;;  %v56_v26 = vshrl.u32 %v55_v25, 7  ;;  %v583_v42 = vld [vmem:[%s787_s3 + $0x78] sm:$0xff]  }
  0x20   :  { %v158_v21 = vsel %vm150_vm0, %v579_v20, 0  ;;  %v155_v24 = vsel %vm150_vm0, %v581_v23, 0  ;;  %v53_v29 = vld [vmem:[%s786_s2] sm:$0x3]  ;;  %v584_v43 = vld [vmem:[%s787_s3 + $0x38] sm:$0xff]   ;;  %v585_v44 = vld [vmem:[%s787_s3 + $0x70] sm:$0xff]   ;;  %533 = vmatprep.subr.bf16.mxu1 %v583_v42 }
  0x21   :  { %v57_v27 = vsub.s32 0, %v56_v26  ;;  %v61_v28 = vsub.s32 1, %v56_v26  ;;  %534 = vmatpush3.bf16.msra.mxu1 %v584_v43  ;;  %v586_v45 = vld [vmem:[%s787_s3 + $0x30] sm:$0xff]   ;;  %v587_v46 = vld [vmem:[%s787_s3 + $0x68] sm:$0xff]   ;;  %v589_v0 = vld [vmem:[%s787_s3 + $0x60] sm:$0xff]  }
  0x22   :  { %535 = vmatprep.subr.bf16.mxu1 %v585_v44  ;;  %v588_v63 = vld [vmem:[%s787_s3 + $0x28] sm:$0xff]   ;;  %v590_v1 = vld [vmem:[%s787_s3 + $0x20] sm:$0xff]   ;;  %v591_v2 = vld [vmem:[%s787_s3 + $0x58] sm:$0xff]  }
  0x23   :  { %v58_v30 = vrot.slane %v53_v29, %v57_v27  ;;  %v62_v31 = vrot.slane %v53_v29, %v61_v28  ;;  %v592_v3 = vld [vmem:[%s787_s3 + $0x18] sm:$0xff]   ;;  %v593_v4 = vld [vmem:[%s787_s3 + $0x50] sm:$0xff]   ;;  %v595_v6 = vld [vmem:[%s787_s3 + $0x48] sm:$0xff]  }
  0x24   :  { %524 = vmatpush3.bf16.xpose.msra.mxu0 %v164_v15  ;;  %v594_v5 = vld [vmem:[%s787_s3 + $0x10] sm:$0xff]   ;;  %v596_v7 = vld [vmem:[%s787_s3 + $0x8] sm:$0xff]   ;;  %v597_v8 = vld [vmem:[%s787_s3 + $0x40] sm:$0xff]  }
  0x25   :  { %560 = vmatprep.subr.msk.bf16.mxu0 %vm150_vm0, %v576_v16  ;;  %536 = vmatpush3.bf16.msra.mxu1 %v586_v45 }
  0x26   :  { %537 = vmatprep.subr.bf16.mxu1 %v587_v46 }
  0x29   :  { %538 = vmatpush3.bf16.msra.mxu1 %v588_v63 }
  0x2a   :  { %539 = vmatprep.subr.bf16.mxu1 %v589_v0 }
  0x2c   :  { %526 = vmatpush3.bf16.xpose.msra.mxu0 %v161_v18 }
  0x2d   :  { %561 = vmatprep.subr.msk.bf16.mxu0 %vm150_vm0, %v578_v19  ;;  %540 = vmatpush3.bf16.msra.mxu1 %v590_v1 }
  0x2e   :  { %541 = vmatprep.subr.bf16.mxu1 %v591_v2 }
  0x31   :  { %542 = vmatpush3.bf16.msra.mxu1 %v592_v3 }
  0x32   :  { %543 = vmatprep.subr.bf16.mxu1 %v593_v4 }
  0x34   :  { %528 = vmatpush3.bf16.xpose.msra.mxu0 %v158_v21 }
  0x35   :  { %562 = vmatprep.subr.msk.bf16.mxu0 %vm150_vm0, %v580_v22  ;;  %544 = vmatpush3.bf16.msra.mxu1 %v594_v5 }
  0x36   :  { %545 = vmatprep.subr.bf16.mxu1 %v595_v6 }
  0x39   :  { %546 = vmatpush3.bf16.msra.mxu1 %v596_v7 }
  0x3a   :  { %547 = vmatprep.subr.bf16.mxu1 %v597_v8 }
  0x3c   :  { %530 = vmatpush3.bf16.xpose.msra.mxu0 %v155_v24 }
  0x43   :  { %532 = vmatmul.mubr.msk.bf16.vlgmr.msra.gmra.mxu0 %vm150_vm0, %v582_v9  ;;  %v598_v9 = vld [vmem:[%s787_s3] sm:$0xff]   ;;  %s633_s3 = smov [#allocation2]  }
  0x44   :  { %548 = vmatpush3.bf16.msra.mxu1 %v598_v9  ;;  %s461_s2 = sshll.u32 %s633_s3, 4  ;;  %s462_s2 = int_to_ptr.vmem [resolvable:$true] %s461_s2 }
  0x45   :  { %s611_s26 = scalar_lea.vmem %s462_s2, 128  ;;  %p616_p1 = scmp.lt.s32.totalorder %s462_s2, %s462_s2 }
  0x46   :  { %p612_p0 = scmp.ne.s32.totalorder %s462_s2, %s611_s26  ;;  %p617_p2 = scmp.lt.s32.totalorder %s611_s26, %s611_s26 }
  0x48   :  { %p618_p3 = por %p617_p2, %p616_p1 }
  0x4a   :  { %p619_p4 = pnand %p618_p3, %p612_p0 }
 0x103   :  { %v236_v32 = vpop.f32.mrf.mxu0 }
 0x104   :  { %v237_v34 = vadd.f32 %v236_v32, %v58_v30 }
 0x105   :  { %v238_v33 = vpop.f32.mrf.mxu0 }
 0x106   :  { %v239_v35 = vadd.f32 %v238_v33, %v62_v31 }
 0x107   :  { %v240_v36 = vpop.f32.mrf.mxu0 }
 0x108   :  { %v245_v37 = vmax.f32 %v237_v34, %v239_v35  ;;  %v241_v39 = vadd.f32 %v240_v36, %v58_v30 }
 0x109   :  { %v242_v38 = vpop.f32.mrf.mxu0 }
 0x10a   :  { %v243_v40 = vadd.f32 %v242_v38, %v62_v31  ;;  %246 = vmax.xlane.f32.xlu0 %v245_v37 }
 0x10c   :  { %v248_v41 = vmax.f32 %v241_v39, %v243_v40 }
 0x10e   :  { %249 = vmax.xlane.f32.xlu0 %v248_v41 }
 0x193   :  { %v247_v47 = vpop.xlane.xlu0 %246 }
 0x194   :  { %v251_v48 = vsub.f32 %v237_v34, %v247_v47  ;;  %v252_v49 = vsub.f32 %v239_v35, %v247_v47 }
 0x196   :  { %v255_v50 = vmul.f32 1.442695, %v251_v48  ;;  %v257_v51 = vmul.f32 1.442695, %v252_v49 }
 0x197   :  { %v250_v52 = vpop.xlane.xlu0 %249 }
 0x198   :  { %599 = vpow2.f32 %v255_v50  ;;  %v253_v53 = vsub.f32 %v241_v39, %v250_v52  ;;  %v254_v54 = vsub.f32 %v243_v40, %v250_v52 }
 0x199   :  { %601 = vpow2.f32 %v257_v51 }
 0x19a   :  { %v259_v55 = vmul.f32 1.442695, %v253_v53  ;;  %v261_v56 = vmul.f32 1.442695, %v254_v54 }
 0x19c   :  { %603 = vpow2.f32 %v259_v55 }
 0x19d   :  { %605 = vpow2.f32 %v261_v56 }
 0x1a5   :  { %v600_v57 = vpop.eup %599 }
 0x1a6   :  { %v602_v58 = vpop.eup %601 }
 0x1a7   :  { %v263_v59 = vadd.f32 %v602_v58, %v600_v57 }
 0x1a9   :  { %v604_v60 = vpop.eup %603  ;;  %264 = vadd.xlane.f32.xlu1 %v263_v59 }
 0x1aa   :  { %v606_v61 = vpop.eup %605 }
 0x1ab   :  { %v266_v62 = vadd.f32 %v606_v61, %v604_v60 }
 0x1ad   :  { %267 = vadd.xlane.f32.xlu1 %v266_v62 }
 0x232   :  { %v265_v10 = vpop.xlane.xlu1 %264 }
 0x233   :  { %607 = vrcp.f32 %v265_v10 }
 0x236   :  { %v268_v11 = vpop.xlane.xlu1 %267 }
 0x237   :  { %609 = vrcp.f32 %v268_v11 }
 0x240   :  { %v608_v12 = vpop.eup %607 }
 0x241   :  { %v272_v14 = vmul.f32 %v608_v12, %v602_v58  ;;  %v271_v16 = vmul.f32 %v608_v12, %v600_v57 }
 0x244   :  { %v610_v13 = vpop.eup %609 }
 0x245   :  { %v274_v15 = vmul.f32 %v610_v13, %v606_v61  ;;  %v273_v17 = vmul.f32 %v610_v13, %v604_v60 }
 0x247   :  { %v276_v18 = vpack.c.bf16 %v274_v15, %v272_v14  ;;  %v275_v19 = vpack.c.bf16 %v273_v17, %v271_v16 }
 0x249   :  { %437 = vmatprep.mubr.bf16.mxu1 %v276_v18 }
 0x24a   :  { %438 = vmatmul.mubr.bf16.vlgmr.msra.gmra.mxu1 %v275_v19 }
 0x30a   :  { %v549_v20 = vpop.f32.mrf.mxu1 }
 0x30c   :  { %v550_v21 = vpop.f32.mrf.mxu1 }
 0x30d   :  { %v551_v24 = vadd.f32 %v550_v21, %v549_v20 }
 0x30e   :  { %v552_v22 = vpop.f32.mrf.mxu1 }
 0x310   :  { %v553_v23 = vpop.f32.mrf.mxu1 }
 0x311   :  { %v554_v25 = vadd.f32 %v553_v23, %v552_v22 }
 0x313   :  { %v513_v26 = vpack.c.bf16 %v554_v25, %v551_v24 }
 0x315   :  { %514 = vst [vmem:[#allocation2] sm:$0xff] %v513_v26  }
 0x316   :  { %622 = shalt.err (!%p619_p4)
}
 0x317   :  { %s634_s27 = smov 64   ;;  %s635_s28 = smov 4  }
 0x318   :  { %467 = dma.vmem_to_hbm [thread:$0]  %s462_s2, 128, %s788_s4, [#allocation3], %s634_s27, %s634_s27, %s635_s28  }
 0x319   :  { %631 = dma.done.wait [#allocation3], 128  }
 0x31a   :  { %632 = vsyncadd [#allocation3], 4294967168 }
 0x31b   :  { %471 = vsyncpa [#allocation3], 1 }

</bundles_post_ra>
